<compile_context>
chip_gen: v7x
topology: tpu7x:2x2x1
jax: 0.10.0
libtpu: 0.0.40
codegen_flags: <defaults>
</compile_context>

<pallas_src>
import jax
import jax.numpy as jnp
from jax.experimental import pallas as pl
from jax.experimental.pallas import tpu as pltpu

_LANE = 128
_SUBLANE = 8


def _elementwise_kernel(x_ref, o1_ref, o2_ref, o3_ref, o4_ref):
    x = x_ref[...]
    o1_ref[...] = x + 2.0
    o2_ref[...] = x - 1.0
    o3_ref[...] = x * 3.0
    o4_ref[...] = x * 0.5  # exact equivalent of x / 2 for floats, cheaper lowering


def _choose_layout(n, itemsize):
    """Pick (rows, cols, block_rows): lane-dense slab + row tiling.

    rows is a multiple of 8, cols a multiple of 128, block_rows divides rows.
    """
    target_block_bytes = 1 << 20  # ~1 MiB per block per buffer (10 MiB total footprint)
    max_block_elems = max(_LANE * _SUBLANE, target_block_bytes // itemsize)

    min_unit = _LANE * _SUBLANE  # 1024 elements = one full (8,128) vreg tile
    n_unit = -(-n // min_unit) * min_unit

    if n_unit <= max_block_elems:
        # Single wide block: (8, n/8) keeps lanes wide & unmasked, one grid step.
        rows = _SUBLANE
        cols = n_unit // _SUBLANE
        return rows, cols, rows

    # Large path: fixed wide lane width, tile over rows.
    cols = 4 * _LANE  # 512 lanes, 4 vregs wide
    block_rows = max_block_elems // cols
    block_rows = max(_SUBLANE, (block_rows // _SUBLANE) * _SUBLANE)
    unit = block_rows * cols
    n_pad = -(-n // unit) * unit
    rows = n_pad // cols
    return rows, cols, block_rows


def pt_module_forward(x):
    """Computes (x + 2, x - 1, x * 3, x / 2) elementwise in a single Pallas kernel."""
    orig_shape = x.shape
    dtype = x.dtype
    n = x.size

    rows, cols, block_rows = _choose_layout(n, jnp.dtype(dtype).itemsize)
    n_pad = rows * cols

    x_flat = x.reshape(-1)
    if n_pad != n:
        x_flat = jnp.pad(x_flat, (0, n_pad - n))
    x2d = x_flat.reshape(rows, cols)

    grid = (rows // block_rows,)
    spec = pl.BlockSpec((block_rows, cols), lambda i: (i, 0))
    out_sds = jax.ShapeDtypeStruct((rows, cols), dtype)

    o1, o2, o3, o4 = pl.pallas_call(
        _elementwise_kernel,
        out_shape=(out_sds, out_sds, out_sds, out_sds),
        grid=grid,
        in_specs=[spec],
        out_specs=(spec, spec, spec, spec),
        compiler_params=pltpu.CompilerParams(
            dimension_semantics=("parallel",),
        ),
    )(x2d)

    def _unflatten(o):
        o = o.reshape(-1)
        if n_pad != n:
            o = o[:n]
        return o.reshape(orig_shape)

    return tuple(_unflatten(o) for o in (o1, o2, o3, o4))


if __name__ == "__main__":
    key = jax.random.PRNGKey(0)
    # NCHW input, small shapes: batch=2, channels=4, spatial=16x16
    x = jax.random.normal(key, (2, 4, 16, 16), dtype=jnp.float32)

    outs = pt_module_forward(x)
    outs = jax.block_until_ready(outs)

    # Verify against plain-JAX reference
    refs = (x + 2.0, x - 1.0, x * 3.0, x / 2.0)
    for o, r in zip(outs, refs):
        assert o.shape == r.shape and o.dtype == r.dtype
        assert jnp.allclose(o, r, atol=1e-6), "mismatch vs reference"

    print("KERNEL_OK")
</pallas_src>

<mosaic_0001>
module attributes {stable_mosaic.version = 11 : i64} {
  func.func @_elementwise_kernel(%arg0: i32, %arg1: memref<8x256xf32, #tpu.memory_space<vmem>>, %arg2: memref<8x256xf32, #tpu.memory_space<vmem>>, %arg3: memref<8x256xf32, #tpu.memory_space<vmem>>, %arg4: memref<8x256xf32, #tpu.memory_space<vmem>>, %arg5: memref<8x256xf32, #tpu.memory_space<vmem>>) attributes {dimension_semantics = [#tpu.dimension_semantics<parallel>], iteration_bounds = array<i64: 1>, scalar_prefetch = 0 : i64, scratch_operands = 0 : i64, tpu.core_type = #tpu.core_type<tc>, window_params = [{transform_indices = @transform_0, window_bounds = array<i64: 8, 256>}, {transform_indices = @transform_1, window_bounds = array<i64: 8, 256>}, {transform_indices = @transform_2, window_bounds = array<i64: 8, 256>}, {transform_indices = @transform_3, window_bounds = array<i64: 8, 256>}, {transform_indices = @transform_4, window_bounds = array<i64: 8, 256>}]} {
    %c0 = arith.constant 0 : index
    %c0_0 = arith.constant 0 : index
    %0 = vector.load %arg1[%c0, %c0_0] : memref<8x256xf32, #tpu.memory_space<vmem>>, vector<8x256xf32>
    %cst = arith.constant 2.000000e+00 : f32
    %1 = vector.broadcast %cst : f32 to vector<8x256xf32>
    %2 = arith.addf %0, %1 : vector<8x256xf32>
    %c0_1 = arith.constant 0 : index
    %c0_2 = arith.constant 0 : index
    %3 = vector.load %arg2[%c0_1, %c0_2] : memref<8x256xf32, #tpu.memory_space<vmem>>, vector<8x256xf32>
    tpu.vector_store %arg2[%c0_1, %c0_2], %2 {strides = array<i32>} : memref<8x256xf32, #tpu.memory_space<vmem>>, vector<8x256xf32>,
    %cst_3 = arith.constant 1.000000e+00 : f32
    %4 = vector.broadcast %cst_3 : f32 to vector<8x256xf32>
    %5 = arith.subf %0, %4 : vector<8x256xf32>
    %c0_4 = arith.constant 0 : index
    %c0_5 = arith.constant 0 : index
    %6 = vector.load %arg3[%c0_4, %c0_5] : memref<8x256xf32, #tpu.memory_space<vmem>>, vector<8x256xf32>
    tpu.vector_store %arg3[%c0_4, %c0_5], %5 {strides = array<i32>} : memref<8x256xf32, #tpu.memory_space<vmem>>, vector<8x256xf32>,
    %cst_6 = arith.constant 3.000000e+00 : f32
    %7 = vector.broadcast %cst_6 : f32 to vector<8x256xf32>
    %8 = arith.mulf %0, %7 : vector<8x256xf32>
    %c0_7 = arith.constant 0 : index
    %c0_8 = arith.constant 0 : index
    %9 = vector.load %arg4[%c0_7, %c0_8] : memref<8x256xf32, #tpu.memory_space<vmem>>, vector<8x256xf32>
    tpu.vector_store %arg4[%c0_7, %c0_8], %8 {strides = array<i32>} : memref<8x256xf32, #tpu.memory_space<vmem>>, vector<8x256xf32>,
    %cst_9 = arith.constant 5.000000e-01 : f32
    %10 = vector.broadcast %cst_9 : f32 to vector<8x256xf32>
    %11 = arith.mulf %0, %10 : vector<8x256xf32>
    %c0_10 = arith.constant 0 : index
    %c0_11 = arith.constant 0 : index
    %12 = vector.load %arg5[%c0_10, %c0_11] : memref<8x256xf32, #tpu.memory_space<vmem>>, vector<8x256xf32>
    tpu.vector_store %arg5[%c0_10, %c0_11], %11 {strides = array<i32>} : memref<8x256xf32, #tpu.memory_space<vmem>>, vector<8x256xf32>,
    return
  }
  func.func @transform_0(%arg0: i32) -> (i32, i32) {
    %c0_i32 = arith.constant 0 : i32
    %c0_i32_0 = arith.constant 0 : i32
    return %arg0, %c0_i32 : i32, i32
  }
  func.func @transform_1(%arg0: i32) -> (i32, i32) {
    %c0_i32 = arith.constant 0 : i32
    %c0_i32_0 = arith.constant 0 : i32
    return %arg0, %c0_i32 : i32, i32
  }
  func.func @transform_2(%arg0: i32) -> (i32, i32) {
    %c0_i32 = arith.constant 0 : i32
    %c0_i32_0 = arith.constant 0 : i32
    return %arg0, %c0_i32 : i32, i32
  }
  func.func @transform_3(%arg0: i32) -> (i32, i32) {
    %c0_i32 = arith.constant 0 : i32
    %c0_i32_0 = arith.constant 0 : i32
    return %arg0, %c0_i32 : i32, i32
  }
  func.func @transform_4(%arg0: i32) -> (i32, i32) {
    %c0_i32 = arith.constant 0 : i32
    %c0_i32_0 = arith.constant 0 : i32
    return %arg0, %c0_i32 : i32, i32
  }
}

</mosaic_0001>

<bundles_post_ra>
// kernel: tpu_custom_call.1
= control target key start
LH: loop header
LB: loop body
LE: loop exit
PB: predicated region body
PF: predicated region fallthrough
CT: control target
= control target key end

     0   :  { %10 = vsyncpa [#allocation3], 0  ;;  %s337_s0 = inlined_call_operand.hbm [shape: f32[8,256], index: 0, kind: input, shape index: {}]   ;;  %s338_s1 = inlined_call_operand.hbm [shape: f32[8,256], index: 1, kind: output, shape index: {0}]   ;;  %s339_s2 = inlined_call_operand.hbm [shape: f32[8,256], index: 2, kind: output, shape index: {1}]   ;;  %s340_s3 = inlined_call_operand.hbm [shape: f32[8,256], index: 3, kind: output, shape index: {2}]   ;;  %s341_s4 = inlined_call_operand.hbm [shape: f32[8,256], index: 4, kind: output, shape index: {3}]  }
   0x1   :  { %11 = vsyncpa [#allocation4], 0 }
   0x2   :  { %12 = vsyncpa [#allocation7], 0 }
   0x3   :  { %13 = vsyncpa [#allocation10], 0  ;;  %s226_s15 = smov [#allocation2]   ;;  %s108_s19 = scalar_lea.hbm %s337_s0, 256 }
   0x4   :  { %s20_s16 = sshll.u32 %s226_s15, 4  ;;  %p109_p0 = scmp.ne.s32.totalorder %s337_s0, %s108_s19  ;;  %s21_s16 = int_to_ptr.vmem [resolvable:$true] %s20_s16 }
   0x5   :  { %p112_p1 = scmp.lt.u32.totalorder %s108_s19, %s337_s0 }
   0x7   :  { %p114_p2 = pnand %p112_p1, %p109_p0 }
   0x9   :  { %117 = shalt.err (!%p114_p2)
}
   0xa   :  { %s118_s24 = scalar_lea.vmem %s21_s16, 256  ;;  %p123_p4 = scmp.lt.s32.totalorder %s21_s16, %s21_s16 }
   0xb   :  { %p119_p3 = scmp.ne.s32.totalorder %s21_s16, %s118_s24  ;;  %p124_p5 = scmp.lt.s32.totalorder %s118_s24, %s118_s24 }
   0xd   :  { %p125_p6 = por %p124_p5, %p123_p4 }
   0xf   :  { %p126_p7 = pnand %p125_p6, %p119_p3 }
  0x11   :  { %129 = shalt.err (!%p126_p7)
}
  0x12   :  { %23 = dma.hbm_to_vmem [thread:$0]  %s337_s0, 256, %s21_s16, [#allocation3]  }
  0x13   :  { %218 = dma.done.wait [#allocation3], 256  }
  0x14   :  { %219 = vsyncadd [#allocation3], 4294967040  ;;  %s227_s27 = smov [#allocation6]   ;;  %s228_s29 = smov [#allocation5]   ;;  %v27_v0 = vld [vmem:[#allocation2] sm:$0xff]  ;;  %v28_v1 = vld [vmem:[#allocation2 + $0x8] sm:$0xff] }
  0x15   :  { %s61_s28 = sshll.u32 %s227_s27, 4  ;;  %s51_s30 = sshll.u32 %s228_s29, 4  ;;  %v101_v2 = vadd.f32 -1.0, %v27_v0  ;;  %v102_v3 = vadd.f32 -1.0, %v28_v1  ;;  %v29_v4 = vadd.f32 2.0, %v27_v0  ;;  %v30_v5 = vadd.f32 2.0, %v28_v1  ;;  %s62_s28 = int_to_ptr.vmem [resolvable:$true] %s61_s28  ;;  %s268_s30 = int_to_ptr.vmem [resolvable:$true] %s51_s30 }
  0x16   :  { %s229_s5 = smov [#allocation8]   ;;  %s230_s7 = smov [#allocation9]   ;;  %v37_v6 = vmul.f32 3.0, %v27_v0  ;;  %v38_v7 = vmul.f32 3.0, %v28_v1  ;;  %v41_v8 = vmul.f32 0.5, %v27_v0  ;;  %v42_v9 = vmul.f32 0.5, %v28_v1 }
  0x17   :  { %s71_s6 = sshll.u32 %s229_s5, 4  ;;  %s81_s8 = sshll.u32 %s230_s7, 4  ;;  %35 = vst [vmem:[#allocation6] sm:$0xff] %v101_v2  ;;  %36 = vst [vmem:[#allocation6 + $0x8] sm:$0xff] %v102_v3  ;;  %s270_s6 = int_to_ptr.vmem [resolvable:$true] %s71_s6  ;;  %s272_s8 = int_to_ptr.vmem [resolvable:$true] %s81_s8 }
  0x18   :  { %31 = vst [vmem:[#allocation5] sm:$0xff] %v29_v4  ;;  %32 = vst [vmem:[#allocation5 + $0x8] sm:$0xff] %v30_v5  ;;  %s130_s0 = scalar_lea.vmem %s62_s28, 256  ;;  %p135_p9 = scmp.lt.s32.totalorder %s62_s28, %s62_s28 }
  0x19   :  { %39 = vst [vmem:[#allocation8] sm:$0xff] %v37_v6  ;;  %40 = vst [vmem:[#allocation8 + $0x8] sm:$0xff] %v38_v7  ;;  %p131_p8 = scmp.ne.s32.totalorder %s62_s28, %s130_s0  ;;  %p136_p10 = scmp.lt.s32.totalorder %s130_s0, %s130_s0 }
  0x1a   :  { %43 = vst [vmem:[#allocation9] sm:$0xff] %v41_v8  ;;  %44 = vst [vmem:[#allocation9 + $0x8] sm:$0xff] %v42_v9 }
  0x1b   :  { %p137_p11 = por %p136_p10, %p135_p9 }
  0x1d   :  { %p138_p12 = pnand %p137_p11, %p131_p8 }
  0x1f   :  { %141 = shalt.err (!%p138_p12)
}
  0x20   :  { %s142_s11 = scalar_lea.hbm %s339_s2, 256 }
  0x21   :  { %p143_p13 = scmp.ne.s32.totalorder %s339_s2, %s142_s11  ;;  %p146_p0 = scmp.lt.u32.totalorder %s142_s11, %s339_s2 }
  0x23   :  { %p148_p1 = pnand %p146_p0, %p143_p13 }
  0x25   :  { %151 = shalt.err (!%p148_p1)
}
  0x26   :  { %64 = dma.vmem_to_hbm [thread:$0]  %s62_s28, 256, %s339_s2, [#allocation7]  }
  0x27   :  { %s152_s18 = scalar_lea.vmem %s268_s30, 256  ;;  %p157_p3 = scmp.lt.s32.totalorder %s268_s30, %s268_s30 }
  0x28   :  { %p153_p2 = scmp.ne.s32.totalorder %s268_s30, %s152_s18  ;;  %p158_p4 = scmp.lt.s32.totalorder %s152_s18, %s152_s18 }
  0x2a   :  { %p159_p5 = por %p158_p4, %p157_p3 }
  0x2c   :  { %p160_p6 = pnand %p159_p5, %p153_p2 }
  0x2e   :  { %163 = shalt.err (!%p160_p6)
}
  0x2f   :  { %s164_s21 = scalar_lea.hbm %s338_s1, 256 }
  0x30   :  { %p165_p7 = scmp.ne.s32.totalorder %s338_s1, %s164_s21  ;;  %p168_p8 = scmp.lt.u32.totalorder %s164_s21, %s338_s1 }
  0x32   :  { %p170_p9 = pnand %p168_p8, %p165_p7 }
  0x34   :  { %173 = shalt.err (!%p170_p9)
}
  0x35   :  { %54 = dma.vmem_to_hbm [thread:$0]  %s268_s30, 256, %s338_s1, [#allocation4]  }
  0x36   :  { %s174_s27 = scalar_lea.vmem %s270_s6, 256  ;;  %p179_p11 = scmp.lt.s32.totalorder %s270_s6, %s270_s6 }
  0x37   :  { %p175_p10 = scmp.ne.s32.totalorder %s270_s6, %s174_s27  ;;  %p180_p12 = scmp.lt.s32.totalorder %s174_s27, %s174_s27 }
  0x39   :  { %p181_p13 = por %p180_p12, %p179_p11 }
  0x3b   :  { %p182_p0 = pnand %p181_p13, %p175_p10 }
  0x3d   :  { %185 = shalt.err (!%p182_p0)
}
  0x3e   :  { %s186_s5 = scalar_lea.hbm %s340_s3, 256 }
  0x3f   :  { %p187_p1 = scmp.ne.s32.totalorder %s340_s3, %s186_s5  ;;  %p190_p2 = scmp.lt.u32.totalorder %s186_s5, %s340_s3 }
  0x41   :  { %p192_p3 = pnand %p190_p2, %p187_p1 }
  0x43   :  { %195 = shalt.err (!%p192_p3)
}
  0x44   :  { %74 = dma.vmem_to_hbm [thread:$0]  %s270_s6, 256, %s340_s3, [#allocation7]  }
  0x45   :  { %s196_s11 = scalar_lea.vmem %s272_s8, 256  ;;  %p201_p5 = scmp.lt.s32.totalorder %s272_s8, %s272_s8 }
  0x46   :  { %p197_p4 = scmp.ne.s32.totalorder %s272_s8, %s196_s11  ;;  %p202_p6 = scmp.lt.s32.totalorder %s196_s11, %s196_s11 }
  0x48   :  { %p203_p7 = por %p202_p6, %p201_p5 }
  0x4a   :  { %p204_p8 = pnand %p203_p7, %p197_p4 }
  0x4c   :  { %207 = shalt.err (!%p204_p8)
}
  0x4d   :  { %s208_s14 = scalar_lea.hbm %s341_s4, 256 }
  0x4e   :  { %p209_p9 = scmp.ne.s32.totalorder %s341_s4, %s208_s14  ;;  %p212_p10 = scmp.lt.u32.totalorder %s208_s14, %s341_s4 }
  0x50   :  { %p214_p11 = pnand %p212_p10, %p209_p9 }
  0x52   :  { %217 = shalt.err (!%p214_p11)
}
  0x53   :  { %84 = dma.vmem_to_hbm [thread:$0]  %s272_s8, 256, %s341_s4, [#allocation10]  }
  0x54   :  { %220 = dma.done.wait [#allocation4], 256  }
  0x55   :  { %221 = vsyncadd [#allocation4], 4294967040 }
  0x56   :  { %222 = dma.done.wait [#allocation7], 512  }
  0x57   :  { %223 = vsyncadd [#allocation7], 4294966784 }
  0x58   :  { %224 = dma.done.wait [#allocation10], 256  }
  0x59   :  { %225 = vsyncadd [#allocation10], 4294967040 }
  0x5a   :  { %97 = vsyncpa [#allocation3], 1 }
  0x5b   :  { %98 = vsyncpa [#allocation4], 1 }
  0x5c   :  { %99 = vsyncpa [#allocation7], 1 }
  0x5d   :  { %100 = vsyncpa [#allocation10], 1 }

</bundles_post_ra>
